<compile_context>
chip_gen: v6e
topology: v6e:2x2x1
jax: 0.10.0
libtpu: 0.0.40
codegen_flags: <defaults>
</compile_context>

<pallas_src>
import functools

import jax
import jax.numpy as jnp
from jax.experimental import pallas as pl
from jax.experimental.pallas import tpu as pltpu


def _round_up(x, m):
    return (x + m - 1) // m * m


# ----------------------------------------------------------------------------
# Pallas kernel: fused conv + bias + sigmoid for one batch image.
#   x_ref   : (1, Cin, Lp)            padded, spatially-flattened image (bf16)
#   w_ref   : (Cout, KH*KW*Cin)       single stacked-K weight matrix (bf16)
#   b_ref   : (Cout, 1)               bias (f32)
#   o_ref   : (1, Cout, M_out)        lane-dense bf16 output (spatial last)
#   rhs_ref : (KH*KW*Cin, M_out)      VMEM scratch holding the stacked RHS
# ----------------------------------------------------------------------------
def _fused_conv_sigmoid_kernel(x_ref, w_ref, b_ref, o_ref, rhs_ref, *,
                               kh, kw, wp, cin, m_out, m_chunk):
    # 1) Build the stacked-K RHS once: each of the kh*kw shifted slices is
    #    loaded / lane-realigned exactly one time (not once per dot operand).
    for t in range(kh * kw):
        ki, kj = divmod(t, kw)
        d = ki * wp + kj                                   # static tap offset
        rhs_ref[t * cin:(t + 1) * cin, :] = x_ref[0, :, d:d + m_out]

    # 2) ONE matmul per M-chunk with K = kh*kw*cin: accumulation stays inside
    #    the MXU; chunking bounds the live f32 accumulator in the vreg file.
    for mc in range(0, m_out, m_chunk):
        mw = min(m_chunk, m_out - mc)
        acc = jnp.dot(w_ref[...], rhs_ref[:, mc:mc + mw],
                      preferred_element_type=jnp.float32)   # (Cout, mw) f32
        z = acc + b_ref[...]                                # bias broadcast
        # sigmoid on the EUP: exp + approximate reciprocal (VALU slots stay free)
        y = pl.reciprocal(1.0 + jnp.exp(-z), approx=True)
        o_ref[0, :, mc:mc + mw] = y.astype(o_ref.dtype)


@functools.partial(jax.jit, static_argnames=("kernel_size", "stride", "padding"))
def coupling_block_forward(x_nchw, weight, bias, *, kernel_size, stride, padding):
    """Equivalent of CouplingBlock.forward: sigmoid(conv2d(x)).

    x_nchw : (N, Cin, H, W)   weight : (Cout, Cin, KH, KW)   bias : (Cout,)
    returns: (N, Cout, Ho, Wo)
    """
    n, cin, h, w = x_nchw.shape
    cout = weight.shape[0]
    kh = kw = kernel_size
    hp, wp = h + 2 * padding, w + 2 * padding
    ho = (hp - kh) // stride + 1
    wo = (wp - kw) // stride + 1

    # ---- layout glue (single pass over the input; no im2col blow-up) -------
    xp = jnp.pad(x_nchw, ((0, 0), (0, 0), (padding, padding), (padding, padding)))
    xf = xp.reshape(n, cin, hp * wp)

    max_d = (kh - 1) * wp + (kw - 1)           # largest tap offset
    m_need = ho * stride * wp                  # flat cols needed for reshape-extract
    m_out = _round_up(m_need, 128)             # lane-dense output width
    lp = _round_up(max(hp * wp, max_d + m_out), 128)
    xf = jnp.pad(xf, ((0, 0), (0, 0), (0, lp - hp * wp))).astype(jnp.bfloat16)

    # Single stacked-K weight matrix: w_mat[o, t*cin + c] == weight[o, c, ki, kj]
    kdim = kh * kw * cin
    w_mat = jnp.transpose(weight, (0, 2, 3, 1)).reshape(cout, kdim).astype(jnp.bfloat16)
    b_col = bias.reshape(cout, 1).astype(jnp.float32)

    m_chunk = min(m_out, 512)                  # bound the live f32 accumulator
    kernel = functools.partial(_fused_conv_sigmoid_kernel,
                               kh=kh, kw=kw, wp=wp, cin=cin,
                               m_out=m_out, m_chunk=m_chunk)

    # ---- VMEM budget computed from actual block sizes ----------------------
    in_block = cin * lp * 2
    out_block = cout * m_out * 2
    w_bytes = cout * kdim * 2
    b_bytes = cout * 1 * 4
    scratch_bytes = kdim * m_out * 2
    vmem_bytes = 2 * (in_block + out_block + w_bytes + b_bytes) + scratch_bytes
    vmem_limit = int(min(max(2 * vmem_bytes + (2 << 20), 4 << 20), 64 << 20))

    cost = pl.CostEstimate(
        flops=2 * n * cout * kdim * m_out,
        transcendentals=n * cout * m_out,
        bytes_accessed=(xf.size * 2 + w_mat.size * 2 + b_col.size * 4
                        + n * cout * m_out * 2),
    )

    # ---- Pallas hot path: one grid step per batch element ------------------
    acc = pl.pallas_call(
        kernel,
        out_shape=jax.ShapeDtypeStruct((n, cout, m_out), jnp.bfloat16),
        grid_spec=pltpu.PrefetchScalarGridSpec(
            num_scalar_prefetch=0,
            grid=(n,),
            in_specs=[
                pl.BlockSpec((1, cin, lp), lambda b: (b, 0, 0)),        # image
                pl.BlockSpec((cout, kdim), lambda b: (0, 0)),           # weights
                pl.BlockSpec((cout, 1), lambda b: (0, 0)),              # bias
            ],
            out_specs=pl.BlockSpec((1, cout, m_out), lambda b: (b, 0, 0)),
            scratch_shapes=[pltpu.VMEM((kdim, m_out), jnp.bfloat16)],
        ),
        compiler_params=pltpu.CompilerParams(
            dimension_semantics=("parallel",),
            vmem_limit_bytes=vmem_limit,
        ),
        cost_estimate=cost,
    )(xf, w_mat, b_col)                                    # (N, Cout, M_out) bf16

    # ---- extract valid columns with a fusable reshape + strided slice ------
    sw = stride * wp
    out = acc[:, :, :ho * sw].reshape(n, cout, ho, sw)[:, :, :, :wo * stride:stride]
    return out.astype(x_nchw.dtype)                        # (N, Cout, Ho, Wo)


if __name__ == "__main__":
    # layer_config = [kernel_size, input_channels, output_channels, stride, padding]
    kernel_size, cin, cout, stride, padding = 3, 4, 8, 1, 1
    n, h, w = 2, 16, 16

    key = jax.random.PRNGKey(0)
    kx, kw_, kb = jax.random.split(key, 3)
    x = jax.random.normal(kx, (n, cin, h, w), dtype=jnp.float32)
    weight = jax.random.normal(kw_, (cout, cin, kernel_size, kernel_size),
                               dtype=jnp.float32) * 0.1
    bias = jax.random.normal(kb, (cout,), dtype=jnp.float32) * 0.1

    out = coupling_block_forward(x, weight, bias,
                                 kernel_size=kernel_size,
                                 stride=stride, padding=padding)
    out = jax.block_until_ready(out)

    # pure-JAX f32 reference (conv2d + sigmoid)
    ref = jax.nn.sigmoid(
        jax.lax.conv_general_dilated(
            x, weight,
            window_strides=(stride, stride),
            padding=[(padding, padding), (padding, padding)],
            dimension_numbers=("NCHW", "OIHW", "NCHW"),
        ) + bias.reshape(1, cout, 1, 1)
    )
    assert out.shape == (n, cout, h, w), out.shape
    # bf16 operands/output with f32 accumulation -> ~1e-3-level error on sigmoids
    assert jnp.allclose(out, ref, atol=2e-2, rtol=2e-2), float(
        jnp.max(jnp.abs(out - ref)))

    print("KERNEL_OK")
</pallas_src>

<mosaic_0001>
module attributes {stable_mosaic.version = 11 : i64} {
  func.func @_fused_conv_sigmoid_kernel(%arg0: i32, %arg1: memref<1x4x512xbf16, #tpu.memory_space<vmem>>, %arg2: memref<8x36xbf16, #tpu.memory_space<vmem>>, %arg3: memref<8x1xf32, #tpu.memory_space<vmem>>, %arg4: memref<1x8x384xbf16, #tpu.memory_space<vmem>>, %arg5: memref<36x384xbf16, #tpu.memory_space<vmem>>) attributes {dimension_semantics = [#tpu.dimension_semantics<parallel>], iteration_bounds = array<i64: 2>, scalar_prefetch = 0 : i64, scratch_operands = 1 : i64, tpu.core_type = #tpu.core_type<tc>, window_params = [{transform_indices = @transform_0, window_bounds = array<i64: 1, 4, 512>}, {pipeline_mode = #tpu.pipeline_mode<synchronous>, transform_indices = @transform_1, window_bounds = array<i64: 8, 36>}, {pipeline_mode = #tpu.pipeline_mode<synchronous>, transform_indices = @transform_2, window_bounds = array<i64: 8, 1>}, {transform_indices = @transform_3, window_bounds = array<i64: 1, 8, 384>}]} {
    %c0 = arith.constant 0 : index
    %c0_0 = arith.constant 0 : index
    %c0_1 = arith.constant 0 : index
    %0 = vector.load %arg1[%c0, %c0_0, %c0_1] : memref<1x4x512xbf16, #tpu.memory_space<vmem>>, vector<1x4x384xbf16>
    %1 = vector.shape_cast %0 : vector<1x4x384xbf16> to vector<4x384xbf16>
    %c0_2 = arith.constant 0 : index
    %c0_3 = arith.constant 0 : index
    %2 = vector.load %arg5[%c0_2, %c0_3] : memref<36x384xbf16, #tpu.memory_space<vmem>>, vector<4x384xbf16>
    tpu.vector_store %arg5[%c0_2, %c0_3], %1 {strides = array<i32>} : memref<36x384xbf16, #tpu.memory_space<vmem>>, vector<4x384xbf16>,
    %c0_4 = arith.constant 0 : index
    %c0_5 = arith.constant 0 : index
    %c1 = arith.constant 1 : index
    %3 = vector.load %arg1[%c0_4, %c0_5, %c1] : memref<1x4x512xbf16, #tpu.memory_space<vmem>>, vector<1x4x384xbf16>
    %4 = vector.shape_cast %3 : vector<1x4x384xbf16> to vector<4x384xbf16>
    %c4 = arith.constant 4 : index
    %c0_6 = arith.constant 0 : index
    %5 = vector.load %arg5[%c4, %c0_6] : memref<36x384xbf16, #tpu.memory_space<vmem>>, vector<4x384xbf16>
    tpu.vector_store %arg5[%c4, %c0_6], %4 {strides = array<i32>} : memref<36x384xbf16, #tpu.memory_space<vmem>>, vector<4x384xbf16>,
    %c0_7 = arith.constant 0 : index
    %c0_8 = arith.constant 0 : index
    %c2 = arith.constant 2 : index
    %6 = vector.load %arg1[%c0_7, %c0_8, %c2] : memref<1x4x512xbf16, #tpu.memory_space<vmem>>, vector<1x4x384xbf16>
    %7 = vector.shape_cast %6 : vector<1x4x384xbf16> to vector<4x384xbf16>
    %c8 = arith.constant 8 : index
    %c0_9 = arith.constant 0 : index
    %8 = vector.load %arg5[%c8, %c0_9] : memref<36x384xbf16, #tpu.memory_space<vmem>>, vector<4x384xbf16>
    tpu.vector_store %arg5[%c8, %c0_9], %7 {strides = array<i32>} : memref<36x384xbf16, #tpu.memory_space<vmem>>, vector<4x384xbf16>,
    %c0_10 = arith.constant 0 : index
    %c0_11 = arith.constant 0 : index
    %c18 = arith.constant 18 : index
    %9 = vector.load %arg1[%c0_10, %c0_11, %c18] : memref<1x4x512xbf16, #tpu.memory_space<vmem>>, vector<1x4x384xbf16>
    %10 = vector.shape_cast %9 : vector<1x4x384xbf16> to vector<4x384xbf16>
    %c12 = arith.constant 12 : index
    %c0_12 = arith.constant 0 : index
    %11 = vector.load %arg5[%c12, %c0_12] : memref<36x384xbf16, #tpu.memory_space<vmem>>, vector<4x384xbf16>
    tpu.vector_store %arg5[%c12, %c0_12], %10 {strides = array<i32>} : memref<36x384xbf16, #tpu.memory_space<vmem>>, vector<4x384xbf16>,
    %c0_13 = arith.constant 0 : index
    %c0_14 = arith.constant 0 : index
    %c19 = arith.constant 19 : index
    %12 = vector.load %arg1[%c0_13, %c0_14, %c19] : memref<1x4x512xbf16, #tpu.memory_space<vmem>>, vector<1x4x384xbf16>
    %13 = vector.shape_cast %12 : vector<1x4x384xbf16> to vector<4x384xbf16>
    %c16 = arith.constant 16 : index
    %c0_15 = arith.constant 0 : index
    %14 = vector.load %arg5[%c16, %c0_15] : memref<36x384xbf16, #tpu.memory_space<vmem>>, vector<4x384xbf16>
    tpu.vector_store %arg5[%c16, %c0_15], %13 {strides = array<i32>} : memref<36x384xbf16, #tpu.memory_space<vmem>>, vector<4x384xbf16>,
    %c0_16 = arith.constant 0 : index
    %c0_17 = arith.constant 0 : index
    %c20 = arith.constant 20 : index
    %15 = vector.load %arg1[%c0_16, %c0_17, %c20] : memref<1x4x512xbf16, #tpu.memory_space<vmem>>, vector<1x4x384xbf16>
    %16 = vector.shape_cast %15 : vector<1x4x384xbf16> to vector<4x384xbf16>
    %c20_18 = arith.constant 20 : index
    %c0_19 = arith.constant 0 : index
    %17 = vector.load %arg5[%c20_18, %c0_19] : memref<36x384xbf16, #tpu.memory_space<vmem>>, vector<4x384xbf16>
    tpu.vector_store %arg5[%c20_18, %c0_19], %16 {strides = array<i32>} : memref<36x384xbf16, #tpu.memory_space<vmem>>, vector<4x384xbf16>,
    %c0_20 = arith.constant 0 : index
    %c0_21 = arith.constant 0 : index
    %c36 = arith.constant 36 : index
    %18 = vector.load %arg1[%c0_20, %c0_21, %c36] : memref<1x4x512xbf16, #tpu.memory_space<vmem>>, vector<1x4x384xbf16>
    %19 = vector.shape_cast %18 : vector<1x4x384xbf16> to vector<4x384xbf16>
    %c24 = arith.constant 24 : index
    %c0_22 = arith.constant 0 : index
    %20 = vector.load %arg5[%c24, %c0_22] : memref<36x384xbf16, #tpu.memory_space<vmem>>, vector<4x384xbf16>
    tpu.vector_store %arg5[%c24, %c0_22], %19 {strides = array<i32>} : memref<36x384xbf16, #tpu.memory_space<vmem>>, vector<4x384xbf16>,
    %c0_23 = arith.constant 0 : index
    %c0_24 = arith.constant 0 : index
    %c37 = arith.constant 37 : index
    %21 = vector.load %arg1[%c0_23, %c0_24, %c37] : memref<1x4x512xbf16, #tpu.memory_space<vmem>>, vector<1x4x384xbf16>
    %22 = vector.shape_cast %21 : vector<1x4x384xbf16> to vector<4x384xbf16>
    %c28 = arith.constant 28 : index
    %c0_25 = arith.constant 0 : index
    %23 = vector.load %arg5[%c28, %c0_25] : memref<36x384xbf16, #tpu.memory_space<vmem>>, vector<4x384xbf16>
    tpu.vector_store %arg5[%c28, %c0_25], %22 {strides = array<i32>} : memref<36x384xbf16, #tpu.memory_space<vmem>>, vector<4x384xbf16>,
    %c0_26 = arith.constant 0 : index
    %c0_27 = arith.constant 0 : index
    %c38 = arith.constant 38 : index
    %24 = vector.load %arg1[%c0_26, %c0_27, %c38] : memref<1x4x512xbf16, #tpu.memory_space<vmem>>, vector<1x4x384xbf16>
    %25 = vector.shape_cast %24 : vector<1x4x384xbf16> to vector<4x384xbf16>
    %c32 = arith.constant 32 : index
    %c0_28 = arith.constant 0 : index
    %26 = vector.load %arg5[%c32, %c0_28] : memref<36x384xbf16, #tpu.memory_space<vmem>>, vector<4x384xbf16>
    tpu.vector_store %arg5[%c32, %c0_28], %25 {strides = array<i32>} : memref<36x384xbf16, #tpu.memory_space<vmem>>, vector<4x384xbf16>,
    %c0_29 = arith.constant 0 : index
    %c0_30 = arith.constant 0 : index
    %27 = vector.load %arg2[%c0_29, %c0_30] : memref<8x36xbf16, #tpu.memory_space<vmem>>, vector<8x36xbf16>
    %c0_31 = arith.constant 0 : index
    %c0_32 = arith.constant 0 : index
    %28 = vector.load %arg5[%c0_31, %c0_32] : memref<36x384xbf16, #tpu.memory_space<vmem>>, vector<36x384xbf16>
    %cst = arith.constant dense<0.000000e+00> : vector<8x384xf32>
    %29 = tpu.matmul %27, %28, %cst {dimension_numbers = #tpu.dot_dimension_numbers<[1], [0], [0], [1], [0, 0, 1, 1], [], []>} : vector<8x36xbf16>, vector<36x384xbf16>, vector<8x384xf32> -> vector<8x384xf32>
    %c0_33 = arith.constant 0 : index
    %c0_34 = arith.constant 0 : index
    %30 = vector.load %arg3[%c0_33, %c0_34] : memref<8x1xf32, #tpu.memory_space<vmem>>, vector<8x1xf32>
    %31 = vector.broadcast %30 : vector<8x1xf32> to vector<8x384xf32>
    %32 = arith.addf %29, %31 : vector<8x384xf32>
    %cst_35 = arith.constant 0.000000e+00 : f32
    %33 = vector.broadcast %cst_35 : f32 to vector<8x384xf32>
    %34 = arith.subf %33, %32 : vector<8x384xf32>
    %35 = math.exp %34 : vector<8x384xf32>
    %cst_36 = arith.constant 1.000000e+00 : f32
    %36 = vector.broadcast %cst_36 : f32 to vector<8x384xf32>
    %37 = arith.addf %36, %35 : vector<8x384xf32>
    %38 = tpu.reciprocal %37 {approx = true} : vector<8x384xf32> -> vector<8x384xf32>
    %39 = arith.truncf %38 : vector<8x384xf32> to vector<8x384xbf16>
    %c0_37 = arith.constant 0 : index
    %c0_38 = arith.constant 0 : index
    %c0_39 = arith.constant 0 : index
    %40 = vector.load %arg4[%c0_37, %c0_38, %c0_39] : memref<1x8x384xbf16, #tpu.memory_space<vmem>>, vector<1x8x384xbf16>
    %41 = vector.shape_cast %40 : vector<1x8x384xbf16> to vector<8x384xbf16>
    %42 = vector.shape_cast %39 : vector<8x384xbf16> to vector<1x8x384xbf16>
    tpu.vector_store %arg4[%c0_37, %c0_38, %c0_39], %42 {strides = array<i32>} : memref<1x8x384xbf16, #tpu.memory_space<vmem>>, vector<1x8x384xbf16>,
    return
  }
  func.func @transform_0(%arg0: i32) -> (i32, i32, i32) {
    %c0_i32 = arith.constant 0 : i32
    %c0_i32_0 = arith.constant 0 : i32
    %c0_i32_1 = arith.constant 0 : i32
    return %arg0, %c0_i32, %c0_i32_0 : i32, i32, i32
  }
  func.func @transform_1(%arg0: i32) -> (i32, i32) {
    %c0_i32 = arith.constant 0 : i32
    %c0_i32_0 = arith.constant 0 : i32
    %c0_i32_1 = arith.constant 0 : i32
    return %c0_i32, %c0_i32_0 : i32, i32
  }
  func.func @transform_2(%arg0: i32) -> (i32, i32) {
    %c0_i32 = arith.constant 0 : i32
    %c0_i32_0 = arith.constant 0 : i32
    %c0_i32_1 = arith.constant 0 : i32
    return %c0_i32, %c0_i32_0 : i32, i32
  }
  func.func @transform_3(%arg0: i32) -> (i32, i32, i32) {
    %c0_i32 = arith.constant 0 : i32
    %c0_i32_0 = arith.constant 0 : i32
    %c0_i32_1 = arith.constant 0 : i32
    return %arg0, %c0_i32, %c0_i32_0 : i32, i32, i32
  }
}

</mosaic_0001>

<bundles_post_ra>
// kernel: coupling_block_forward.1
= control target key start
LH: loop header
LB: loop body
LE: loop exit
PB: predicated region body
PF: predicated region fallthrough
CT: control target
= control target key end

     0   :  { %s810_s12 = smov 0   ;;  %s854_s0 = inlined_call_operand.vmem [shape: bf16[2,4,512], index: 0, kind: input, shape index: {}]   ;;  %s855_s1 = inlined_call_operand.vmem [shape: bf16[8,36], index: 1, kind: input, shape index: {}]   ;;  %s856_s2 = inlined_call_operand.vmem [shape: f32[8,1], index: 2, kind: input, shape index: {}]   ;;  %s857_s3 = inlined_call_operand.vmem [shape: bf16[2,8,384], index: 3, kind: output, shape index: {}]  }
   0x1 LB: > { %s679_s13 = sadd.s32 4294967295, %s776_s12   ;;  %p683_p0 = scmp.ge.s32.totalorder %s776_s12, 1  ;;  %s776_s12 = sphi %s810_s12, %s13_s12  }
   0x2   : > { %p137_p1 = scmp.lt.s32.totalorder %s776_s12, 3 }
   0x4   : > { %p138_p2 = pnand %p683_p0, %p137_p1 }
   0x5   : > { %p161_p3 = scmp.lt.s32.totalorder (!%p138_p2), %s679_s13, 1  ;;  %s779_s18 = smov (!%p138_p2), 90  }
   0x6   : > { %141 = sbr.rel (%p138_p2) target bundleno = 413 (0x19d), region = 32  ;;  %s780_s19 = smov (!%p138_p2), 109  }
   0x7   : > { %s782_s20 = smov (!%p138_p2), 108   ;;  %s783_s21 = smov (!%p138_p2), 92  }
   0x8   : > { %s784_s22 = smov (!%p138_p2), 91   ;;  %s785_s23 = smov (!%p138_p2), 127  }
   0x9   : > { %s786_s24 = smov (!%p138_p2), 126   ;;  %s787_s25 = smov (!%p138_p2), 110  }
   0xb   : > { %v199_v0 = vlaneseq  ;;  %v778_v1 = vmov 1983009808   ;;  %s859_s13 = smov (!%p161_p3, %s679_s13), 1  ;;  %v781_v11 = vmov 0.0   ;;  %vm788_vm0 = vmmov 0   ;;  %v453_v16 = vld [vmem:[%s856_s2] sm:$0xff] }
   0xc   : > { %v197_v2 = vunpack.c.l.s4 %v778_v1  ;;  %s705_s14 = sshll.u32 %s859_s13, 3  ;;  %712 = vmatprep.subr.bf16.mxu1 %v781_v11  ;;  %718 = vmatprep.mubr.msk.bf16.mxu1 %vm788_vm0, %v781_v11  ;;  %v789_v15 = vmov 0   ;;  %vm216_vm1 = vcmask 1043456   ;;  %vm435_vm2 = vcmask 736256   ;;  %s722_s30 = smul.u32 12, %s859_s13 }
   0xd   : > { %v200_v3 = vshrl.u32 %v199_v0, 7  ;;  %s165_s17 = scalar_lea.vmem %s854_s0, %s705_s14  ;;  %545 = vmatprep.mubr.bf16.mxu0 %v789_v15  ;;  %743 = vset.pattern.permute.xlu0 %v789_v15  ;;  %vm342_vm3 = vcmask 883712   ;;  %vm311_vm4 = vcmask 891904   ;;  %vm373_vm5 = vcmask 752640  }
   0xe   : > { %v198_v4 = vunpack.c.0.s8 %v197_v2  ;;  %v411_v6 = vld [vmem:[%s165_s17] sm:$0xff]  ;;  %vm503_vm6 = vcmask 1041408   ;;  %vm404_vm7 = vcmask 744448   ;;  %vm218_vm8 = vcmask 1039360   ;;  %s170_s6 = scalar_lea.vmem %s857_s3, %s722_s30 }
   0xf   : > { %v413_v8 = vcombine.high %v411_v6, %v411_v6  ;;  %v320_v10 = vcombine.low %v411_v6, %v411_v6  ;;  %v172_v13 = vld [vmem:[%s165_s17] sm:$0x3f]  ;;  %vm249_vm9 = vcmask 1031168   ;;  %vm280_vm10 = vcmask 900096  }
  0x10   : > { %v201_v5 = vsub.s32 %v198_v4, %v200_v3  ;;  %v174_v14 = vcombine.high %v172_v13, %v172_v13  ;;  %687 = vst.sshfl [vmem:[#allocation2] sm:$0xf pattern:$0x76325410] %v172_v13  ;;  %vm499_vm11 = vcmask 293888  }
  0x12   : > { %v420_v7 = vrot.slane %v411_v6, %v201_v5  ;;  %v427_v9 = vrot.slane %v413_v8, %v201_v5  ;;  %v327_v12 = vrot.slane %v320_v10, %v201_v5  ;;  %688 = vst.sshfl [vmem:[#allocation2 + $0x8] sm:$0x3 pattern:$0x76325410] %v174_v14 }
  0x14   : > { %428 = vrot.lane.b32.xlu0 %v420_v7, %s779_s18  ;;  %304 = vrot.lane.b32.xlu1 %v420_v7, %s780_s19 }
  0x18   : > { %430 = vrot.lane.b32.xlu0 %v427_v9, %s779_s18  ;;  %337 = vrot.lane.b32.xlu1 %v420_v7, %s782_s20 }
  0x1c   : > { %335 = vrot.lane.b32.xlu0 %v327_v12, %s782_s20  ;;  %306 = vrot.lane.b32.xlu1 %v427_v9, %s780_s19 }
  0x20   : > { %366 = vrot.lane.b32.xlu0 %v420_v7, %s783_s21  ;;  %368 = vrot.lane.b32.xlu1 %v427_v9, %s783_s21 }
  0x24   : > { %397 = vrot.lane.b32.xlu0 %v327_v12, %s784_s22  ;;  %399 = vrot.lane.b32.xlu1 %v420_v7, %s784_s22 }
  0x28   : > { %212 = vrot.lane.b32.xlu1 %v420_v7, %s785_s23  ;;  %210 = vrot.lane.b32.xlu0 %v327_v12, %s785_s23 }
  0x2c   : > { %244 = vrot.lane.b32.xlu1 %v427_v9, %s786_s24  ;;  %242 = vrot.lane.b32.xlu0 %v420_v7, %s786_s24 }
  0x30   : > { %275 = vrot.lane.b32.xlu1 %v420_v7, %s787_s25  ;;  %273 = vrot.lane.b32.xlu0 %v327_v12, %s787_s25 }
  0x34   : > { %456 = vperm.xlu0 %743, %v453_v16  }
  0x86   : > { %v429_v17 = vpop.permute.xlu0 %428  ;;  %v305_v18 = vpop.permute.xlu1 %304 }
  0x87   : > { %v432_v21 = vrot.slane %v429_v17, 4  ;;  %v308_v30 = vrot.slane %v305_v18, 4 }
  0x8a   : > { %v431_v19 = vpop.permute.xlu0 %430  ;;  %v338_v20 = vpop.permute.xlu1 %337 }
  0x8b   : > { %v433_v22 = vrot.slane %v431_v19, 4  ;;  %v340_v23 = vrot.slane %v338_v20, 4 }
  0x8d   : > { %v434_v24 = vsel %vm216_vm1, %v432_v21, %v433_v22  ;;  %v437_v25 = vsel %vm435_vm2, %v431_v19, %v433_v22  ;;  %v344_v26 = vsel %vm342_vm3, %v338_v20, %v340_v23  ;;  %v442_v22 = vld [vmem:[%s855_s1] sm:$0xf] }
  0x8e   : > { %v436_v27 = vsel %vm435_vm2, %v429_v17, %v434_v24  ;;  %441 = vst [vmem:[#allocation2 + $0x38] sm:$0x3] %v437_v25  ;;  %348 = vst [vmem:[#allocation2 + $0x20] sm:$0xc] %v344_v26  ;;  %v336_v28 = vpop.permute.xlu0 %335  ;;  %v307_v29 = vpop.permute.xlu1 %306 }
  0x8f   : > { %440 = vst [vmem:[#allocation2 + $0x30] sm:$0x33] %v436_v27  ;;  %v339_v31 = vrot.slane %v336_v28, 4  ;;  %v309_v32 = vrot.slane %v307_v29, 4 }
  0x91   : > { %v341_v33 = vsel %vm216_vm1, %v339_v31, %v340_v23  ;;  %v310_v34 = vsel %vm216_vm1, %v308_v30, %v309_v32  ;;  %v313_v35 = vsel %vm311_vm4, %v307_v29, %v309_v32 }
  0x92   : > { %v343_v36 = vsel %vm342_vm3, %v336_v28, %v341_v33  ;;  %v312_v37 = vsel %vm311_vm4, %v305_v18, %v310_v34  ;;  %317 = vst [vmem:[#allocation2 + $0x20] sm:$0x3] %v313_v35  ;;  %v367_v38 = vpop.permute.xlu0 %366  ;;  %v369_v39 = vpop.permute.xlu1 %368 }
  0x93   : > { %347 = vst [vmem:[#allocation2 + $0x18] sm:$0xcc] %v343_v36  ;;  %316 = vst [vmem:[#allocation2 + $0x18] sm:$0x33] %v312_v37  ;;  %v370_v40 = vrot.slane %v367_v38, 4  ;;  %v371_v41 = vrot.slane %v369_v39, 4 }
  0x95   : > { %v372_v42 = vsel %vm216_vm1, %v370_v40, %v371_v41  ;;  %v375_v43 = vsel %vm373_vm5, %v369_v39, %v371_v41  ;;  %v747_v44 = vld [vmem:[#allocation2 + $0x38] ss:$0 sps:$4 sm:$0x33]  }
  0x96   : > { %v374_v45 = vsel %vm373_vm5, %v367_v38, %v372_v42  ;;  %379 = vst [vmem:[#allocation2 + $0x2c] sm:$0x3] %v375_v43  ;;  %v398_v46 = vpop.permute.xlu0 %397  ;;  %v400_v47 = vpop.permute.xlu1 %399  ;;  %v451_v48 = vld [vmem:[#allocation2 + $0x30] sm:$0x33]  ;;  %v511_v52 = vsel %vm503_vm6, %v747_v44, 0 }
  0x97   : > { %378 = vst [vmem:[#allocation2 + $0x24] sm:$0x33] %v374_v45  ;;  %v401_v49 = vrot.slane %v398_v46, 4  ;;  %v402_v50 = vrot.slane %v400_v47, 4  ;;  %v696_v51 = vcombine.high %v451_v48, %v451_v48  ;;  %713 = vmatpush3.bf16.msra.mxu1 %v511_v52  ;;  %v695_v53 = vcombine.low %v451_v48, %v451_v48 }
  0x98   : > { %714 = vmatprep.subr.bf16.mxu1 %v781_v11 }
  0x99   : > { %v403_v54 = vsel %vm216_vm1, %v401_v49, %v402_v50  ;;  %v406_v55 = vsel %vm404_vm7, %v400_v47, %v402_v50  ;;  %698 = vmatprep.subr.msk.bf16.mxu0 %vm503_vm6, %v696_v51  ;;  %v505_v57 = vsel %vm503_vm6, %v695_v53, 0 }
  0x9a   : > { %v405_v56 = vsel %vm404_vm7, %v398_v46, %v403_v54  ;;  %410 = vst [vmem:[#allocation2 + $0x2c] sm:$0xc] %v406_v55  ;;  %v213_v58 = vpop.permute.xlu1 %212  ;;  %v211_v59 = vpop.permute.xlu0 %210  ;;  %524 = vmatpush1.bf16.msra.mxu0 %v505_v57 }
  0x9b   : > { %409 = vst [vmem:[#allocation2 + $0x24] sm:$0xcc] %v405_v56  ;;  %v215_v60 = vrot.slane %v213_v58, 4  ;;  %v214_v61 = vrot.slane %v211_v59, 4 }
  0x9d   : > { %v220_v62 = vsel %vm218_vm8, %v213_v58, %v215_v60  ;;  %v217_v63 = vsel %vm216_vm1, %v214_v61, %v215_v60 }
  0x9e   : > { %224 = vst [vmem:[#allocation2 + $0x8] sm:$0xc] %v220_v62  ;;  %v219_v0 = vsel %vm218_vm8, %v211_v59, %v217_v63  ;;  %v245_v1 = vpop.permute.xlu1 %244  ;;  %v243_v2 = vpop.permute.xlu0 %242 }
  0x9f   : > { %223 = vst [vmem:[#allocation2] sm:$0xcc] %v219_v0  ;;  %v247_v3 = vrot.slane %v245_v1, 4  ;;  %v246_v4 = vrot.slane %v243_v2, 4 }
  0xa1   : > { %v251_v5 = vsel %vm249_vm9, %v245_v1, %v247_v3  ;;  %v248_v6 = vsel %vm216_vm1, %v246_v4, %v247_v3  ;;  %v749_v7 = vld [vmem:[#allocation2 + $0x20] ss:$12 sps:$4 sm:$0xff]  }
  0xa2   : > { %255 = vst [vmem:[#allocation2 + $0x14] sm:$0x3] %v251_v5  ;;  %v250_v8 = vsel %vm249_vm9, %v243_v2, %v248_v6  ;;  %v276_v9 = vpop.permute.xlu1 %275  ;;  %v274_v10 = vpop.permute.xlu0 %273  ;;  %v750_v12 = vld [vmem:[#allocation2 + $0x1c] ss:$12 sps:$4 sm:$0xff]   ;;  %v752_v13 = vld [vmem:[#allocation2 + $0x18] ss:$12 sps:$4 sm:$0xff]   ;;  %715 = vmatpush3.bf16.msra.mxu1 %v749_v7 }
  0xa3   : > { %254 = vst [vmem:[#allocation2 + $0xc] sm:$0x33] %v250_v8  ;;  %v278_v14 = vrot.slane %v276_v9, 4  ;;  %v277_v15 = vrot.slane %v274_v10, 4  ;;  %525 = vmatprep.subr.bf16.mxu0 %v750_v12  ;;  %716 = vmatprep.subr.bf16.mxu1 %v781_v11 }
  0xa4   : > { %526 = vmatpush1.bf16.msra.mxu0 %v752_v13 }
  0xa5   : > { %v282_v16 = vsel %vm280_vm10, %v276_v9, %v278_v14  ;;  %v279_v17 = vsel %vm216_vm1, %v277_v15, %v278_v14 }
  0xa6   : > { %286 = vst [vmem:[#allocation2 + $0x14] sm:$0xc] %v282_v16  ;;  %v281_v18 = vsel %vm280_vm10, %v274_v10, %v279_v17 }
  0xa7   : > { %285 = vst [vmem:[#allocation2 + $0xc] sm:$0xcc] %v281_v18 }
  0xad   : > { %v754_v19 = vld [vmem:[#allocation2 + $0x8] ss:$12 sps:$4 sm:$0xff]  }
  0xae   : > { %v755_v20 = vld [vmem:[#allocation2 + $0x4] ss:$12 sps:$4 sm:$0xff]   ;;  %v757_v21 = vld [vmem:[#allocation2] ss:$12 sps:$4 sm:$0xff]   ;;  %717 = vmatpush3.bf16.msra.mxu1 %v754_v19 }
  0xaf   : > { %527 = vmatprep.subr.bf16.mxu0 %v755_v20  ;;  %v457_v23 = vpop.permute.xlu0 %456 }
  0xb0   : > { %528 = vmatpush1.bf16.msra.mxu0 %v757_v21 }
  0xb1   : > { %719 = vmatmul.mubr.msk.bf16.vlgmr.msra.gmra.mxu1 %vm499_vm11, %v442_v22 }
  0xb3   : > { %699 = vmatmul.mubr.msk.bf16.vlgmr.msra.gmra.mxu0 %vm499_vm11, %v442_v22 }
 0x171   : > { %v588_v11 = vpop.f32.mrf.mxu1 }
 0x172   : > { %v589_v24 = vadd.f32 %v588_v11, %v457_v23 }
 0x173   : > { %v547_v25 = vpop.f32.mrf.mxu0  ;;  %v720_v26 = vpop.f32.mrf.mxu1 }
 0x174   : > { %v596_v27 = vsub.f32 0.0, %v589_v24  ;;  %v548_v28 = vadd.f32 %v547_v25, %v457_v23 }
 0x175   : > { %v549_v29 = vpop.f32.mrf.mxu0  ;;  %v591_v30 = vpop.f32.mrf.mxu1 }
 0x176   : > { %v601_v31 = vmul.f32 1.442695, %v596_v27  ;;  %v594_v32 = vsub.f32 0.0, %v548_v28  ;;  %v550_v33 = vadd.f32 %v549_v29, %v457_v23 }
 0x177   : > { %v551_v34 = vpop.f32.mrf.mxu0  ;;  %v721_v35 = vpop.f32.mrf.mxu1 }
 0x178   : > { %758 = vpow2.f32 %v601_v31  ;;  %v597_v36 = vmul.f32 1.442695, %v594_v32  ;;  %v595_v37 = vsub.f32 0.0, %v550_v33 }
 0x179   : > { %v552_v38 = vpop.f32.mrf.mxu0 }
 0x17a   : > { %760 = vpow2.f32 %v597_v36  ;;  %v599_v39 = vmul.f32 1.442695, %v595_v37 }
 0x17c   : > { %762 = vpow2.f32 %v599_v39 }
 0x185   : > { %v759_v40 = vpop.eup %758 }
 0x186   : > { %v605_v41 = vadd.f32 1.0, %v759_v40 }
 0x187   : > { %v761_v42 = vpop.eup %760 }
 0x188   : > { %764 = vrcp.f32 %v605_v41  ;;  %v603_v43 = vadd.f32 1.0, %v761_v42 }
 0x189   : > { %v763_v44 = vpop.eup %762 }
 0x18a   : > { %v604_v45 = vadd.f32 1.0, %v763_v44  ;;  %766 = vrcp.f32 %v603_v43 }
 0x18c   : > { %768 = vrcp.f32 %v604_v45 }
 0x195   : > { %v765_v46 = vpop.eup %764 }
 0x196   : > { %v707_v47 = vpack.c.bf16 %v765_v46, %v765_v46 }
 0x197   : > { %v767_v48 = vpop.eup %766 }
 0x198   : > { %623 = vst [vmem:[%s170_s6 + $0x8] sm:$0xf] %v707_v47 }
 0x199   : > { %v769_v49 = vpop.eup %768 }
 0x19a   : > { %v706_v50 = vpack.c.bf16 %v769_v49, %v767_v48 }
 0x19c   : > { %622 = vst [vmem:[%s170_s6] sm:$0xff] %v706_v50 }
 0x19d PF: > { %s13_s12 = sadd.s32 1, %s776_s12  }
 0x19e   : > { %p10_p4 = scmp.ge.s32.totalorder %s13_s12, 4  }
 0x1a0   :  { %12 = sbr.rel (!%p10_p4) target bundleno = 1 (0x1), region = 62 }

</bundles_post_ra>
